<compile_context>
chip_gen: v6e
topology: v6e:2x2x1
jax: 0.10.0
libtpu: 0.0.40
codegen_flags: <defaults>
</compile_context>

<pallas_src>
import functools

import jax
import jax.numpy as jnp
from jax.experimental import pallas as pl
from jax.experimental.pallas import tpu as pltpu

FEATURE_LEN = 1536
HIDDEN = 64
OUT = 3

HIDDEN_PAD = 128   # lane-dense hidden width (zero-padded)
OUT_PAD = 128      # lane-dense output width (zero-padded)
DEFAULT_TB = 1024  # batch tile; ~3 MiB bf16 x-tile, fits v5e/v6e/v7x VMEM


def _round_up(n, m):
    return ((n + m - 1) // m) * m


def center_decoder_kernel(x_ref, w1_ref, b1_ref, w2_ref, b2_ref, out_ref):
    # Hidden layer: (TB,1536)bf16 @ (1536,128)bf16 -> f32 acc, + bias, ReLU.
    h = jnp.dot(x_ref[...], w1_ref[...], preferred_element_type=jnp.float32)
    h = jnp.maximum(h + b1_ref[...], 0.0)
    # Output layer: (TB,128)f32 @ (128,128)f32 -> f32, + bias, sigmoid.
    o = jnp.dot(h, w2_ref[...], preferred_element_type=jnp.float32)
    o = o + b2_ref[...]
    out_ref[...] = jax.nn.sigmoid(o)


@functools.partial(jax.jit, static_argnames=("tb",))
def center_decoder_forward(x, w1, b1, w2, b2, *, tb=DEFAULT_TB):
    """x: (..., 1536) -> (center: (B,2), depth: (B,)) with B = prod(leading dims).

    Parameters keep their natural shapes (w1:(1536,64), b1:(1,64), w2:(64,3),
    b2:(1,3)); lane padding happens here (cheap, folded under jit).
    """
    x2d = x.reshape(-1, FEATURE_LEN)
    B = x2d.shape[0]

    # Tile/padding choice: multiple of 8 sublanes, capped at `tb`.
    TB = min(tb, _round_up(B, 8))
    B_pad = _round_up(B, TB)
    if B_pad != B:
        x2d = jnp.pad(x2d, ((0, B_pad - B), (0, 0)))

    # bf16 streaming operands (HBM-bandwidth dominated by x).
    x_bf = x2d.astype(jnp.bfloat16)
    w1_p = jnp.pad(w1, ((0, 0), (0, HIDDEN_PAD - HIDDEN))).astype(jnp.bfloat16)
    b1_p = jnp.pad(b1, ((0, 0), (0, HIDDEN_PAD - HIDDEN))).astype(jnp.float32)
    w2_p = jnp.pad(w2, ((0, HIDDEN_PAD - HIDDEN), (0, OUT_PAD - OUT))).astype(jnp.float32)
    b2_p = jnp.pad(b2, ((0, 0), (0, OUT_PAD - OUT))).astype(jnp.float32)

    grid = (B_pad // TB,)

    cost = pl.CostEstimate(
        flops=2 * B_pad * FEATURE_LEN * HIDDEN_PAD + 2 * B_pad * HIDDEN_PAD * OUT_PAD,
        transcendentals=B_pad * OUT_PAD,
        bytes_accessed=(B_pad * FEATURE_LEN * 2            # x (bf16)
                        + FEATURE_LEN * HIDDEN_PAD * 2     # w1 (bf16)
                        + HIDDEN_PAD * 4 + HIDDEN_PAD * OUT_PAD * 4 + OUT_PAD * 4
                        + B_pad * OUT_PAD * 4),            # output (f32)
    )

    out = pl.pallas_call(
        center_decoder_kernel,
        out_shape=jax.ShapeDtypeStruct((B_pad, OUT_PAD), jnp.float32),
        grid_spec=pltpu.PrefetchScalarGridSpec(
            num_scalar_prefetch=0,
            grid=grid,
            in_specs=[
                pl.BlockSpec((TB, FEATURE_LEN), lambda i: (i, 0)),
                pl.BlockSpec((FEATURE_LEN, HIDDEN_PAD), lambda i: (0, 0)),
                pl.BlockSpec((1, HIDDEN_PAD), lambda i: (0, 0)),
                pl.BlockSpec((HIDDEN_PAD, OUT_PAD), lambda i: (0, 0)),
                pl.BlockSpec((1, OUT_PAD), lambda i: (0, 0)),
            ],
            out_specs=pl.BlockSpec((TB, OUT_PAD), lambda i: (i, 0)),
        ),
        compiler_params=pltpu.CompilerParams(
            dimension_semantics=("parallel",),
            vmem_limit_bytes=32 * 1024 * 1024,
        ),
        cost_estimate=cost,
    )(x_bf, w1_p, b1_p, w2_p, b2_p)

    out = out[:B, :OUT]
    center = out[..., :2]
    depth = out[..., -1]
    return center, depth


def init_params(key):
    """Deterministic synthetic init mirroring the module's parameter shapes.

    PyTorch: fc[0].weight (64,1536), fc[0].bias (64,), fc[2].weight (3,64) with
    xavier_normal_, fc[2].bias (3,). We store the weights transposed (in, out).
    """
    k1, k2, k3, k4 = jax.random.split(key, 4)
    # Layer 1: default nn.Linear init ~ U(-1/sqrt(fan_in), 1/sqrt(fan_in))
    bound1 = 1.0 / jnp.sqrt(FEATURE_LEN)
    w1 = jax.random.uniform(k1, (FEATURE_LEN, HIDDEN), jnp.float32, -bound1, bound1)
    b1 = jax.random.uniform(k2, (1, HIDDEN), jnp.float32, -bound1, bound1)
    # Layer 2: xavier_normal_ -> std = sqrt(2 / (fan_in + fan_out))
    std2 = jnp.sqrt(2.0 / (HIDDEN + OUT))
    w2 = jax.random.normal(k3, (HIDDEN, OUT), jnp.float32) * std2
    bound2 = 1.0 / jnp.sqrt(HIDDEN)
    b2 = jax.random.uniform(k4, (1, OUT), jnp.float32, -bound2, bound2)
    return w1, b1, w2, b2


if __name__ == "__main__":
    key = jax.random.PRNGKey(0)
    kx, kp = jax.random.split(key)

    # Small batch consistent with the forward (x.view(-1, 1536))
    B = 2
    x = jax.random.normal(kx, (B, FEATURE_LEN), jnp.float32)

    w1, b1, w2, b2 = init_params(kp)

    center, depth = center_decoder_forward(x, w1, b1, w2, b2)
    jax.block_until_ready(center)
    jax.block_until_ready(depth)

    # Reference check in plain JAX (match the kernel's bf16 input path for x/W1,
    # f32 everywhere else).
    x_bf = x.astype(jnp.bfloat16).astype(jnp.float32)
    w1_bf = w1.astype(jnp.bfloat16).astype(jnp.float32)
    ref = jax.nn.sigmoid(jnp.maximum(x_bf @ w1_bf + b1, 0.0) @ w2 + b2)
    # Loose check against the full-f32 reference as well (bf16 input rounding).
    ref_f32 = jax.nn.sigmoid(jnp.maximum(x @ w1 + b1, 0.0) @ w2 + b2)

    assert center.shape == (B, 2) and depth.shape == (B,)
    assert jnp.allclose(center, ref[:, :2], atol=1e-3)
    assert jnp.allclose(depth, ref[:, -1], atol=1e-3)
    assert jnp.allclose(center, ref_f32[:, :2], atol=3e-2)
    assert jnp.allclose(depth, ref_f32[:, -1], atol=3e-2)

    print("KERNEL_OK")
</pallas_src>

<mosaic_0001>
module attributes {stable_mosaic.version = 11 : i64} {
  func.func @center_decoder_kernel(%arg0: i32, %arg1: memref<8x1536xbf16, #tpu.memory_space<vmem>>, %arg2: memref<1536x128xbf16, #tpu.memory_space<vmem>>, %arg3: memref<1x128xf32, #tpu.memory_space<vmem>>, %arg4: memref<128x128xf32, #tpu.memory_space<vmem>>, %arg5: memref<1x128xf32, #tpu.memory_space<vmem>>, %arg6: memref<8x128xf32, #tpu.memory_space<vmem>>) attributes {dimension_semantics = [#tpu.dimension_semantics<parallel>], iteration_bounds = array<i64: 1>, scalar_prefetch = 0 : i64, scratch_operands = 0 : i64, tpu.core_type = #tpu.core_type<tc>, window_params = [{transform_indices = @transform_0, window_bounds = array<i64: 8, 1536>}, {pipeline_mode = #tpu.pipeline_mode<synchronous>, transform_indices = @transform_1, window_bounds = array<i64: 1536, 128>}, {pipeline_mode = #tpu.pipeline_mode<synchronous>, transform_indices = @transform_2, window_bounds = array<i64: 1, 128>}, {pipeline_mode = #tpu.pipeline_mode<synchronous>, transform_indices = @transform_3, window_bounds = array<i64: 128, 128>}, {pipeline_mode = #tpu.pipeline_mode<synchronous>, transform_indices = @transform_4, window_bounds = array<i64: 1, 128>}, {transform_indices = @transform_5, window_bounds = array<i64: 8, 128>}]} {
    %c0 = arith.constant 0 : index
    %c0_0 = arith.constant 0 : index
    %0 = vector.load %arg1[%c0, %c0_0] : memref<8x1536xbf16, #tpu.memory_space<vmem>>, vector<8x1536xbf16>
    %c0_1 = arith.constant 0 : index
    %c0_2 = arith.constant 0 : index
    %1 = vector.load %arg2[%c0_1, %c0_2] : memref<1536x128xbf16, #tpu.memory_space<vmem>>, vector<1536x128xbf16>
    %cst = arith.constant dense<0.000000e+00> : vector<8x128xf32>
    %2 = tpu.matmul %0, %1, %cst {dimension_numbers = #tpu.dot_dimension_numbers<[1], [0], [0], [1], [0, 0, 1, 1], [], []>} : vector<8x1536xbf16>, vector<1536x128xbf16>, vector<8x128xf32> -> vector<8x128xf32>
    %c0_3 = arith.constant 0 : index
    %c0_4 = arith.constant 0 : index
    %3 = vector.load %arg3[%c0_3, %c0_4] : memref<1x128xf32, #tpu.memory_space<vmem>>, vector<1x128xf32>
    %4 = vector.broadcast %3 : vector<1x128xf32> to vector<8x128xf32>
    %5 = arith.addf %2, %4 : vector<8x128xf32>
    %cst_5 = arith.constant 0.000000e+00 : f32
    %6 = vector.broadcast %cst_5 : f32 to vector<8x128xf32>
    %7 = arith.maximumf %5, %6 : vector<8x128xf32>
    %c0_6 = arith.constant 0 : index
    %c0_7 = arith.constant 0 : index
    %8 = vector.load %arg4[%c0_6, %c0_7] : memref<128x128xf32, #tpu.memory_space<vmem>>, vector<128x128xf32>
    %cst_8 = arith.constant dense<0.000000e+00> : vector<8x128xf32>
    %9 = tpu.matmul %7, %8, %cst_8 {dimension_numbers = #tpu.dot_dimension_numbers<[1], [0], [0], [1], [0, 0, 1, 1], [], []>} : vector<8x128xf32>, vector<128x128xf32>, vector<8x128xf32> -> vector<8x128xf32>
    %c0_9 = arith.constant 0 : index
    %c0_10 = arith.constant 0 : index
    %10 = vector.load %arg5[%c0_9, %c0_10] : memref<1x128xf32, #tpu.memory_space<vmem>>, vector<1x128xf32>
    %11 = vector.broadcast %10 : vector<1x128xf32> to vector<8x128xf32>
    %12 = arith.addf %9, %11 : vector<8x128xf32>
    %13 = arith.negf %12 : vector<8x128xf32>
    %14 = math.exp %13 : vector<8x128xf32>
    %cst_11 = arith.constant 1.000000e+00 : f32
    %15 = vector.broadcast %cst_11 : f32 to vector<8x128xf32>
    %16 = arith.addf %15, %14 : vector<8x128xf32>
    %17 = arith.divf %15, %16 : vector<8x128xf32>
    %c0_12 = arith.constant 0 : index
    %c0_13 = arith.constant 0 : index
    %18 = vector.load %arg6[%c0_12, %c0_13] : memref<8x128xf32, #tpu.memory_space<vmem>>, vector<8x128xf32>
    tpu.vector_store %arg6[%c0_12, %c0_13], %17 {strides = array<i32>} : memref<8x128xf32, #tpu.memory_space<vmem>>, vector<8x128xf32>,
    return
  }
  func.func @transform_0(%arg0: i32) -> (i32, i32) {
    %c0_i32 = arith.constant 0 : i32
    %c0_i32_0 = arith.constant 0 : i32
    return %arg0, %c0_i32 : i32, i32
  }
  func.func @transform_1(%arg0: i32) -> (i32, i32) {
    %c0_i32 = arith.constant 0 : i32
    %c0_i32_0 = arith.constant 0 : i32
    %c0_i32_1 = arith.constant 0 : i32
    return %c0_i32, %c0_i32_0 : i32, i32
  }
  func.func @transform_2(%arg0: i32) -> (i32, i32) {
    %c0_i32 = arith.constant 0 : i32
    %c0_i32_0 = arith.constant 0 : i32
    %c0_i32_1 = arith.constant 0 : i32
    return %c0_i32, %c0_i32_0 : i32, i32
  }
  func.func @transform_3(%arg0: i32) -> (i32, i32) {
    %c0_i32 = arith.constant 0 : i32
    %c0_i32_0 = arith.constant 0 : i32
    %c0_i32_1 = arith.constant 0 : i32
    return %c0_i32, %c0_i32_0 : i32, i32
  }
  func.func @transform_4(%arg0: i32) -> (i32, i32) {
    %c0_i32 = arith.constant 0 : i32
    %c0_i32_0 = arith.constant 0 : i32
    %c0_i32_1 = arith.constant 0 : i32
    return %c0_i32, %c0_i32_0 : i32, i32
  }
  func.func @transform_5(%arg0: i32) -> (i32, i32) {
    %c0_i32 = arith.constant 0 : i32
    %c0_i32_0 = arith.constant 0 : i32
    return %arg0, %c0_i32 : i32, i32
  }
}

</mosaic_0001>

<bundles_post_ra>
// kernel: center_decoder_forward.1
= control target key start
LH: loop header
LB: loop body
LE: loop exit
PB: predicated region body
PF: predicated region fallthrough
CT: control target
= control target key end

     0   :  { %vm1599_vm0 = vmmov 0   ;;  %s1993_s1 = inlined_call_operand.vmem [shape: bf16[1536,128], index: 1, kind: input, shape index: {}]   ;;  %s1994_s0 = inlined_call_operand.vmem [shape: bf16[8,1536], index: 0, kind: input, shape index: {}]   ;;  %s1995_s3 = inlined_call_operand.vmem [shape: f32[128,128], index: 3, kind: input, shape index: {}]   ;;  %s1996_s2 = inlined_call_operand.vmem [shape: f32[1,128], index: 2, kind: input, shape index: {}]   ;;  %s1997_s4 = inlined_call_operand.vmem [shape: f32[1,128], index: 4, kind: input, shape index: {}]   ;;  %s1998_s5 = inlined_call_operand.vmem [shape: f32[8,128], index: 5, kind: output, shape index: {}]  }
   0x1   :  { %v1486_v0 = vld [vmem:[%s1993_s1 + $0x78] sm:$0xff]   ;;  %v1490_v4 = vld [vmem:[%s1993_s1 + $0x70] sm:$0xff]   ;;  %v1494_v8 = vld [vmem:[%s1993_s1 + $0x68] sm:$0xff]  }
   0x2   :  { %v1487_v1 = vld [vmem:[%s1993_s1 + $0xf8] sm:$0xff]   ;;  %1300 = vmatprep.subr.bf16.mxu0 %v1486_v0  ;;  %v1491_v5 = vld [vmem:[%s1993_s1 + $0xf0] sm:$0xff]   ;;  %v1495_v9 = vld [vmem:[%s1993_s1 + $0xe8] sm:$0xff]  }
   0x3   :  { %v1488_v2 = vld [vmem:[%s1993_s1 + $0x38] sm:$0xff]   ;;  %1322 = vmatprep.subr.bf16.mxu1 %v1487_v1  ;;  %v1492_v6 = vld [vmem:[%s1993_s1 + $0x30] sm:$0xff]   ;;  %v1496_v10 = vld [vmem:[%s1993_s1 + $0x28] sm:$0xff]  }
   0x4   :  { %v1489_v3 = vld [vmem:[%s1993_s1 + $0xb8] sm:$0xff]   ;;  %1301 = vmatpush3.bf16.msra.mxu0 %v1488_v2  ;;  %v1493_v7 = vld [vmem:[%s1993_s1 + $0xb0] sm:$0xff]   ;;  %v1497_v11 = vld [vmem:[%s1993_s1 + $0xa8] sm:$0xff]  }
   0x5   :  { %1323 = vmatpush3.bf16.msra.mxu1 %v1489_v3  ;;  %1302 = vmatprep.subr.bf16.mxu0 %v1490_v4  ;;  %v1498_v12 = vld [vmem:[%s1993_s1 + $0x60] sm:$0xff]   ;;  %v1502_v16 = vld [vmem:[%s1993_s1 + $0x58] sm:$0xff]   ;;  %v1506_v20 = vld [vmem:[%s1993_s1 + $0x50] sm:$0xff]  }
   0x6   :  { %1324 = vmatprep.subr.bf16.mxu1 %v1491_v5  ;;  %v1499_v13 = vld [vmem:[%s1993_s1 + $0xe0] sm:$0xff]   ;;  %v1503_v17 = vld [vmem:[%s1993_s1 + $0xd8] sm:$0xff]   ;;  %v1507_v21 = vld [vmem:[%s1993_s1 + $0xd0] sm:$0xff]  }
   0x7   :  { %v1500_v14 = vld [vmem:[%s1993_s1 + $0x20] sm:$0xff]   ;;  %v1504_v18 = vld [vmem:[%s1993_s1 + $0x18] sm:$0xff]   ;;  %v1508_v22 = vld [vmem:[%s1993_s1 + $0x10] sm:$0xff]  }
   0x8   :  { %1303 = vmatpush3.bf16.msra.mxu0 %v1492_v6  ;;  %v1501_v15 = vld [vmem:[%s1993_s1 + $0xa0] sm:$0xff]   ;;  %v1505_v19 = vld [vmem:[%s1993_s1 + $0x98] sm:$0xff]   ;;  %v1509_v23 = vld [vmem:[%s1993_s1 + $0x90] sm:$0xff]  }
   0x9   :  { %1325 = vmatpush3.bf16.msra.mxu1 %v1493_v7  ;;  %1304 = vmatprep.subr.bf16.mxu0 %v1494_v8  ;;  %v1510_v24 = vld [vmem:[%s1993_s1 + $0x48] sm:$0xff]   ;;  %v1514_v28 = vld [vmem:[%s1993_s1 + $0x40] sm:$0xff]   ;;  %v1522_v38 = vld [vmem:[%s1993_s1 + $0x178] sm:$0xff]  }
   0xa   :  { %1326 = vmatprep.subr.bf16.mxu1 %v1495_v9  ;;  %v1511_v25 = vld [vmem:[%s1993_s1 + $0xc8] sm:$0xff]   ;;  %v1515_v29 = vld [vmem:[%s1993_s1 + $0xc0] sm:$0xff]   ;;  %v1523_v39 = vld [vmem:[%s1993_s1 + $0x1f8] sm:$0xff]  }
   0xb   :  { %v1512_v26 = vld [vmem:[%s1993_s1 + $0x8] sm:$0xff]   ;;  %v1516_v30 = vld [vmem:[%s1993_s1] sm:$0xff]   ;;  %v1524_v40 = vld [vmem:[%s1993_s1 + $0x138] sm:$0xff]  }
   0xc   :  { %1305 = vmatpush3.bf16.msra.mxu0 %v1496_v10  ;;  %v1513_v27 = vld [vmem:[%s1993_s1 + $0x88] sm:$0xff]   ;;  %v1517_v31 = vld [vmem:[%s1993_s1 + $0x80] sm:$0xff]   ;;  %v1525_v41 = vld [vmem:[%s1993_s1 + $0x1b8] sm:$0xff]  }
   0xd   :  { %1327 = vmatpush3.bf16.msra.mxu1 %v1497_v11  ;;  %1306 = vmatprep.subr.bf16.mxu0 %v1498_v12  ;;  %v21_v32 = vld [vmem:[%s1994_s0] sm:$0xff]  ;;  %v22_v33 = vld [vmem:[%s1994_s0 + $0x8] sm:$0xff]  ;;  %v1526_v42 = vld [vmem:[%s1993_s1 + $0x170] sm:$0xff]  }
   0xe   :  { %1328 = vmatprep.subr.bf16.mxu1 %v1499_v13  ;;  %v1190_v34 = vcombine.low %v21_v32, %v21_v32  ;;  %v1191_v35 = vcombine.high %v21_v32, %v21_v32  ;;  %v1192_v36 = vcombine.low %v22_v33, %v22_v33  ;;  %v1193_v37 = vcombine.high %v22_v33, %v22_v33  ;;  %v1527_v43 = vld [vmem:[%s1993_s1 + $0x1f0] sm:$0xff]   ;;  %v1530_v46 = vld [vmem:[%s1993_s1 + $0x168] sm:$0xff]   ;;  %v1534_v50 = vld [vmem:[%s1993_s1 + $0x160] sm:$0xff]  }
   0xf   :  { %v1528_v44 = vld [vmem:[%s1993_s1 + $0x130] sm:$0xff]   ;;  %v1531_v47 = vld [vmem:[%s1993_s1 + $0x1e8] sm:$0xff]   ;;  %v1535_v51 = vld [vmem:[%s1993_s1 + $0x1e0] sm:$0xff]  }
  0x10   :  { %1307 = vmatpush3.bf16.msra.mxu0 %v1500_v14  ;;  %876 = vmatprep.mubr.bf16.mxu0 %v1191_v35  ;;  %v1529_v45 = vld [vmem:[%s1993_s1 + $0x1b0] sm:$0xff]   ;;  %v1532_v48 = vld [vmem:[%s1993_s1 + $0x128] sm:$0xff]   ;;  %v1536_v52 = vld [vmem:[%s1993_s1 + $0x120] sm:$0xff]  }
  0x11   :  { %1329 = vmatpush3.bf16.msra.mxu1 %v1501_v15  ;;  %1308 = vmatprep.subr.bf16.mxu0 %v1502_v16  ;;  %v1533_v49 = vld [vmem:[%s1993_s1 + $0x1a8] sm:$0xff]   ;;  %v1537_v53 = vld [vmem:[%s1993_s1 + $0x1a0] sm:$0xff]   ;;  %v1538_v54 = vld [vmem:[%s1993_s1 + $0x158] sm:$0xff]  }
  0x12   :  { %1330 = vmatprep.subr.bf16.mxu1 %v1503_v17  ;;  %916 = vmatprep.mubr.bf16.mxu1 %v1193_v37  ;;  %v1539_v55 = vld [vmem:[%s1993_s1 + $0x1d8] sm:$0xff]   ;;  %v1542_v58 = vld [vmem:[%s1993_s1 + $0x150] sm:$0xff]   ;;  %v1546_v62 = vld [vmem:[%s1993_s1 + $0x148] sm:$0xff]  }
  0x13   :  { %v1540_v56 = vld [vmem:[%s1993_s1 + $0x118] sm:$0xff]   ;;  %v1543_v59 = vld [vmem:[%s1993_s1 + $0x1d0] sm:$0xff]   ;;  %v1547_v63 = vld [vmem:[%s1993_s1 + $0x1c8] sm:$0xff]  }
  0x14   :  { %1309 = vmatpush3.bf16.msra.mxu0 %v1504_v18  ;;  %v1541_v57 = vld [vmem:[%s1993_s1 + $0x198] sm:$0xff]   ;;  %v1544_v60 = vld [vmem:[%s1993_s1 + $0x110] sm:$0xff]   ;;  %v1548_v0 = vld [vmem:[%s1993_s1 + $0x108] sm:$0xff]  }
  0x15   :  { %1331 = vmatpush3.bf16.msra.mxu1 %v1505_v19  ;;  %1310 = vmatprep.subr.bf16.mxu0 %v1506_v20  ;;  %v1545_v61 = vld [vmem:[%s1993_s1 + $0x190] sm:$0xff]   ;;  %v1549_v1 = vld [vmem:[%s1993_s1 + $0x188] sm:$0xff]   ;;  %v1550_v2 = vld [vmem:[%s1993_s1 + $0x140] sm:$0xff]  }
  0x16   :  { %1332 = vmatprep.subr.bf16.mxu1 %v1507_v21  ;;  %v1551_v3 = vld [vmem:[%s1993_s1 + $0x1c0] sm:$0xff]   ;;  %v23_v6 = vld [vmem:[%s1994_s0 + $0x10] sm:$0xff]  ;;  %v24_v9 = vld [vmem:[%s1994_s0 + $0x18] sm:$0xff] }
  0x17   :  { %v1552_v4 = vld [vmem:[%s1993_s1 + $0x100] sm:$0xff]   ;;  %v1194_v7 = vcombine.low %v23_v6, %v23_v6  ;;  %v1195_v8 = vcombine.high %v23_v6, %v23_v6  ;;  %v1196_v10 = vcombine.low %v24_v9, %v24_v9  ;;  %v1197_v11 = vcombine.high %v24_v9, %v24_v9  ;;  %v1558_v12 = vld [vmem:[%s1993_s1 + $0x278] sm:$0xff]   ;;  %v1562_v16 = vld [vmem:[%s1993_s1 + $0x270] sm:$0xff]  }
  0x18   :  { %1311 = vmatpush3.bf16.msra.mxu0 %v1508_v22  ;;  %v1553_v5 = vld [vmem:[%s1993_s1 + $0x180] sm:$0xff]   ;;  %v1559_v13 = vld [vmem:[%s1993_s1 + $0x2f8] sm:$0xff]   ;;  %v1563_v17 = vld [vmem:[%s1993_s1 + $0x2f0] sm:$0xff]  }
  0x19   :  { %1333 = vmatpush3.bf16.msra.mxu1 %v1509_v23  ;;  %1312 = vmatprep.subr.bf16.mxu0 %v1510_v24  ;;  %v1560_v14 = vld [vmem:[%s1993_s1 + $0x238] sm:$0xff]   ;;  %v1564_v18 = vld [vmem:[%s1993_s1 + $0x230] sm:$0xff]   ;;  %v1566_v20 = vld [vmem:[%s1993_s1 + $0x268] sm:$0xff]  }
  0x1a   :  { %1334 = vmatprep.subr.bf16.mxu1 %v1511_v25  ;;  %v1561_v15 = vld [vmem:[%s1993_s1 + $0x2b8] sm:$0xff]   ;;  %v1565_v19 = vld [vmem:[%s1993_s1 + $0x2b0] sm:$0xff]   ;;  %v1567_v21 = vld [vmem:[%s1993_s1 + $0x2e8] sm:$0xff]  }
  0x1b   :  { %v1568_v22 = vld [vmem:[%s1993_s1 + $0x228] sm:$0xff]   ;;  %v1570_v24 = vld [vmem:[%s1993_s1 + $0x260] sm:$0xff]   ;;  %v1578_v32 = vld [vmem:[%s1993_s1 + $0x250] sm:$0xff]  }
  0x1c   :  { %1313 = vmatpush3.bf16.msra.mxu0 %v1512_v26  ;;  %v1569_v23 = vld [vmem:[%s1993_s1 + $0x2a8] sm:$0xff]   ;;  %v1571_v25 = vld [vmem:[%s1993_s1 + $0x2e0] sm:$0xff]   ;;  %v1579_v33 = vld [vmem:[%s1993_s1 + $0x2d0] sm:$0xff]  }
  0x1d   :  { %1335 = vmatpush3.bf16.msra.mxu1 %v1513_v27  ;;  %1314 = vmatprep.subr.bf16.mxu0 %v1514_v28  ;;  %v1572_v26 = vld [vmem:[%s1993_s1 + $0x220] sm:$0xff]   ;;  %v1574_v28 = vld [vmem:[%s1993_s1 + $0x258] sm:$0xff]   ;;  %v1581_v35 = vld [vmem:[%s1993_s1 + $0x290] sm:$0xff]  }
  0x1e   :  { %1336 = vmatprep.subr.bf16.mxu1 %v1515_v29  ;;  %v1573_v27 = vld [vmem:[%s1993_s1 + $0x2a0] sm:$0xff]   ;;  %v1575_v29 = vld [vmem:[%s1993_s1 + $0x2d8] sm:$0xff]   ;;  %v1583_v37 = vld [vmem:[%s1993_s1 + $0x2c8] sm:$0xff]  }
  0x20   :  { %1315 = vmatpush3.bf16.msra.mxu0 %v1516_v30  ;;  %v1576_v30 = vld [vmem:[%s1993_s1 + $0x218] sm:$0xff]  }
  0x21   :  { %1337 = vmatpush3.bf16.msra.mxu1 %v1517_v31  ;;  %1344 = vmatprep.subr.bf16.mxu0 %v1522_v38  ;;  %v1577_v31 = vld [vmem:[%s1993_s1 + $0x298] sm:$0xff]   ;;  %v1584_v38 = vld [vmem:[%s1993_s1 + $0x208] sm:$0xff]  }
  0x22   :  { %1366 = vmatprep.subr.bf16.mxu1 %v1523_v39  ;;  %v1585_v39 = vld [vmem:[%s1993_s1 + $0x288] sm:$0xff]  }
  0x23   :  { %877 = vmatmul.mubr.bf16.vlgmr.msra.gmra.mxu0 %v1190_v34  ;;  %v1580_v34 = vld [vmem:[%s1993_s1 + $0x210] sm:$0xff]  }
  0x24   :  { %917 = vmatmul.mubr.bf16.vlgmr.msra.gmra.mxu1 %v1192_v36  ;;  %1345 = vmatpush3.bf16.msra.mxu0 %v1524_v40  ;;  %v1582_v36 = vld [vmem:[%s1993_s1 + $0x248] sm:$0xff]   ;;  %v1586_v40 = vld [vmem:[%s1993_s1 + $0x240] sm:$0xff]  }
  0x25   :  { %1367 = vmatpush3.bf16.msra.mxu1 %v1525_v41  ;;  %1346 = vmatprep.subr.bf16.mxu0 %v1526_v42  ;;  %v1587_v41 = vld [vmem:[%s1993_s1 + $0x2c0] sm:$0xff]  }
  0x26   :  { %1368 = vmatprep.subr.bf16.mxu1 %v1527_v43  ;;  %956 = vmatprep.mubr.bf16.mxu0 %v1195_v8  ;;  %v1588_v42 = vld [vmem:[%s1993_s1 + $0x200] sm:$0xff]  }
  0x27   :  { %996 = vmatprep.mubr.bf16.mxu1 %v1197_v11  ;;  %v1589_v43 = vld [vmem:[%s1993_s1 + $0x280] sm:$0xff]  }
  0x28   :  { %1347 = vmatpush3.bf16.msra.mxu0 %v1528_v44  ;;  %v25_v44 = vld [vmem:[%s1994_s0 + $0x20] sm:$0xff] }
  0x29   :  { %1369 = vmatpush3.bf16.msra.mxu1 %v1529_v45  ;;  %1348 = vmatprep.subr.bf16.mxu0 %v1530_v46  ;;  %v26_v45 = vld [vmem:[%s1994_s0 + $0x28] sm:$0xff]  ;;  %v1198_v46 = vcombine.low %v25_v44, %v25_v44 }
  0x2a   :  { %1370 = vmatprep.subr.bf16.mxu1 %v1531_v47  ;;  %v1199_v47 = vcombine.high %v25_v44, %v25_v44 }
  0x2c   :  { %1349 = vmatpush3.bf16.msra.mxu0 %v1532_v48  ;;  %v1200_v48 = vcombine.low %v26_v45, %v26_v45 }
  0x2d   :  { %1371 = vmatpush3.bf16.msra.mxu1 %v1533_v49  ;;  %1350 = vmatprep.subr.bf16.mxu0 %v1534_v50  ;;  %v1201_v49 = vcombine.high %v26_v45, %v26_v45  ;;  %v1598_v50 = vmov 0.0  }
  0x2e   :  { %1372 = vmatprep.subr.bf16.mxu1 %v1535_v51  ;;  %v1100_v51 = vld [vmem:[%s1995_s3 + $0x78] sm:$0xff] }
  0x30   :  { %1351 = vmatpush3.bf16.msra.mxu0 %v1536_v52  ;;  %v1099_v52 = vld [vmem:[%s1995_s3 + $0x70] sm:$0xff] }
  0x31   :  { %1373 = vmatpush3.bf16.msra.mxu1 %v1537_v53  ;;  %1352 = vmatprep.subr.bf16.mxu0 %v1538_v54  ;;  %v1098_v53 = vld [vmem:[%s1995_s3 + $0x68] sm:$0xff]  ;;  %v1097_v54 = vld [vmem:[%s1995_s3 + $0x60] sm:$0xff] }
  0x32   :  { %1374 = vmatprep.subr.bf16.mxu1 %v1539_v55  ;;  %v1096_v55 = vld [vmem:[%s1995_s3 + $0x58] sm:$0xff] }
  0x34   :  { %1353 = vmatpush3.bf16.msra.mxu0 %v1540_v56  ;;  %v1095_v56 = vld [vmem:[%s1995_s3 + $0x50] sm:$0xff] }
  0x35   :  { %1375 = vmatpush3.bf16.msra.mxu1 %v1541_v57  ;;  %1354 = vmatprep.subr.bf16.mxu0 %v1542_v58  ;;  %v1094_v57 = vld [vmem:[%s1995_s3 + $0x48] sm:$0xff]  ;;  %v1093_v58 = vld [vmem:[%s1995_s3 + $0x40] sm:$0xff] }
  0x36   :  { %1376 = vmatprep.subr.bf16.mxu1 %v1543_v59  ;;  %v1092_v59 = vld [vmem:[%s1995_s3 + $0x38] sm:$0xff] }
  0x38   :  { %1355 = vmatpush3.bf16.msra.mxu0 %v1544_v60  ;;  %v1091_v60 = vld [vmem:[%s1995_s3 + $0x30] sm:$0xff] }
  0x39   :  { %1377 = vmatpush3.bf16.msra.mxu1 %v1545_v61  ;;  %1356 = vmatprep.subr.bf16.mxu0 %v1546_v62  ;;  %v1090_v61 = vld [vmem:[%s1995_s3 + $0x28] sm:$0xff]  ;;  %v1089_v62 = vld [vmem:[%s1995_s3 + $0x20] sm:$0xff] }
  0x3a   :  { %1378 = vmatprep.subr.bf16.mxu1 %v1547_v63  ;;  %v1088_v63 = vld [vmem:[%s1995_s3 + $0x18] sm:$0xff] }
  0x3c   :  { %1357 = vmatpush3.bf16.msra.mxu0 %v1548_v0  ;;  %v1087_v0 = vld [vmem:[%s1995_s3 + $0x10] sm:$0xff] }
  0x3d   :  { %1379 = vmatpush3.bf16.msra.mxu1 %v1549_v1  ;;  %1358 = vmatprep.subr.bf16.mxu0 %v1550_v2  ;;  %v1086_v1 = vld [vmem:[%s1995_s3 + $0x8] sm:$0xff]  ;;  %v1085_v2 = vld [vmem:[%s1995_s3] sm:$0xff] }
  0x3e   :  { %1380 = vmatprep.subr.bf16.mxu1 %v1551_v3 }
  0x40   :  { %1359 = vmatpush3.bf16.msra.mxu0 %v1552_v4 }
  0x41   :  { %1381 = vmatpush3.bf16.msra.mxu1 %v1553_v5  ;;  %1388 = vmatprep.subr.bf16.mxu0 %v1558_v12 }
  0x42   :  { %1410 = vmatprep.subr.bf16.mxu1 %v1559_v13 }
  0x43   :  { %957 = vmatmul.mubr.bf16.vlgmr.msra.gmra.mxu0 %v1194_v7 }
  0x44   :  { %997 = vmatmul.mubr.bf16.vlgmr.msra.gmra.mxu1 %v1196_v10  ;;  %1389 = vmatpush3.bf16.msra.mxu0 %v1560_v14 }
  0x45   :  { %1411 = vmatpush3.bf16.msra.mxu1 %v1561_v15  ;;  %1390 = vmatprep.subr.bf16.mxu0 %v1562_v16 }
  0x46   :  { %1412 = vmatprep.subr.bf16.mxu1 %v1563_v17  ;;  %1036 = vmatprep.mubr.bf16.mxu0 %v1199_v47 }
  0x47   :  { %1076 = vmatprep.mubr.bf16.mxu1 %v1201_v49 }
  0x48   :  { %1391 = vmatpush3.bf16.msra.mxu0 %v1564_v18 }
  0x49   :  { %1413 = vmatpush3.bf16.msra.mxu1 %v1565_v19  ;;  %1392 = vmatprep.subr.bf16.mxu0 %v1566_v20  ;;  %v1189_v20 = vld [vmem:[%s1996_s2] ss:$0 sm:$0xff] }
  0x4a   :  { %1414 = vmatprep.subr.bf16.mxu1 %v1567_v21 }
  0x4c   :  { %1393 = vmatpush3.bf16.msra.mxu0 %v1568_v22 }
  0x4d   :  { %1415 = vmatpush3.bf16.msra.mxu1 %v1569_v23  ;;  %1394 = vmatprep.subr.bf16.mxu0 %v1570_v24 }
  0x4e   :  { %1416 = vmatprep.subr.bf16.mxu1 %v1571_v25 }
  0x50   :  { %1395 = vmatpush3.bf16.msra.mxu0 %v1572_v26 }
  0x51   :  { %1417 = vmatpush3.bf16.msra.mxu1 %v1573_v27  ;;  %1396 = vmatprep.subr.bf16.mxu0 %v1574_v28 }
  0x52   :  { %1418 = vmatprep.subr.bf16.mxu1 %v1575_v29 }
  0x54   :  { %1397 = vmatpush3.bf16.msra.mxu0 %v1576_v30 }
  0x55   :  { %1419 = vmatpush3.bf16.msra.mxu1 %v1577_v31  ;;  %1398 = vmatprep.subr.bf16.mxu0 %v1578_v32 }
  0x56   :  { %1420 = vmatprep.subr.bf16.mxu1 %v1579_v33 }
  0x58   :  { %1399 = vmatpush3.bf16.msra.mxu0 %v1580_v34 }
  0x59   :  { %1421 = vmatpush3.bf16.msra.mxu1 %v1581_v35  ;;  %1400 = vmatprep.subr.bf16.mxu0 %v1582_v36 }
  0x5a   :  { %1422 = vmatprep.subr.bf16.mxu1 %v1583_v37 }
  0x5c   :  { %1401 = vmatpush3.bf16.msra.mxu0 %v1584_v38 }
  0x5d   :  { %1423 = vmatpush3.bf16.msra.mxu1 %v1585_v39  ;;  %1402 = vmatprep.subr.bf16.mxu0 %v1586_v40 }
  0x5e   :  { %1424 = vmatprep.subr.bf16.mxu1 %v1587_v41  ;;  %v1298_v41 = vld [vmem:[%s1997_s4] ss:$0 sm:$0xff] }
  0x60   :  { %1403 = vmatpush3.bf16.msra.mxu0 %v1588_v42 }
  0x61   :  { %1425 = vmatpush3.bf16.msra.mxu1 %v1589_v43  ;;  %1449 = vmatprep.subr.mxu0 %v1598_v50 }
  0x63   :  { %1037 = vmatmul.mubr.bf16.vlgmr.msra.gmra.mxu0 %v1198_v46 }
  0x64   :  { %1077 = vmatmul.mubr.bf16.vlgmr.msra.gmra.mxu1 %v1200_v48  ;;  %1450 = vmatpush3.msra.mxu0 %v1100_v51 }
  0x65   :  { %1451 = vmatprep.subr.mxu0 %v1598_v50  ;;  %1481 = vmatprep.mubr.msk.f32.mxu0 %vm1599_vm0, %v1598_v50 }
  0x66   :  { %1452 = vmatpush3.msra.mxu0 %v1099_v52 }
  0x67   :  { %1453 = vmatprep.subr.mxu0 %v1598_v50 }
  0x68   :  { %1454 = vmatpush3.msra.mxu0 %v1098_v53 }
  0x69   :  { %1455 = vmatprep.subr.mxu0 %v1598_v50 }
  0x6a   :  { %1456 = vmatpush3.msra.mxu0 %v1097_v54 }
  0x6b   :  { %1457 = vmatprep.subr.mxu0 %v1598_v50 }
  0x6c   :  { %1458 = vmatpush3.msra.mxu0 %v1096_v55 }
  0x6d   :  { %1459 = vmatprep.subr.mxu0 %v1598_v50 }
  0x6e   :  { %1460 = vmatpush3.msra.mxu0 %v1095_v56 }
  0x6f   :  { %1461 = vmatprep.subr.mxu0 %v1598_v50 }
  0x70   :  { %1462 = vmatpush3.msra.mxu0 %v1094_v57 }
  0x71   :  { %1463 = vmatprep.subr.mxu0 %v1598_v50 }
  0x72   :  { %1464 = vmatpush3.msra.mxu0 %v1093_v58 }
  0x73   :  { %1465 = vmatprep.subr.mxu0 %v1598_v50 }
  0x74   :  { %1466 = vmatpush3.msra.mxu0 %v1092_v59 }
  0x75   :  { %1467 = vmatprep.subr.mxu0 %v1598_v50 }
  0x76   :  { %1468 = vmatpush3.msra.mxu0 %v1091_v60 }
  0x77   :  { %1469 = vmatprep.subr.mxu0 %v1598_v50 }
  0x78   :  { %1470 = vmatpush3.msra.mxu0 %v1090_v61 }
  0x79   :  { %1471 = vmatprep.subr.mxu0 %v1598_v50 }
  0x7a   :  { %1472 = vmatpush3.msra.mxu0 %v1089_v62 }
  0x7b   :  { %1473 = vmatprep.subr.mxu0 %v1598_v50 }
  0x7c   :  { %1474 = vmatpush3.msra.mxu0 %v1088_v63 }
  0x7d   :  { %1475 = vmatprep.subr.mxu0 %v1598_v50 }
  0x7e   :  { %1476 = vmatpush3.msra.mxu0 %v1087_v0 }
  0x7f   :  { %1477 = vmatprep.subr.mxu0 %v1598_v50 }
  0x80   :  { %1478 = vmatpush3.msra.mxu0 %v1086_v1 }
  0x81   :  { %1479 = vmatprep.subr.mxu0 %v1598_v50 }
  0x82   :  { %1480 = vmatpush3.msra.mxu0 %v1085_v2 }
  0xe3   :  { %v1316_v3 = vpop.f32.mrf.mxu0 }
  0xe4   :  { %v1338_v4 = vpop.f32.mrf.mxu1 }
  0xe5   :  { %v1317_v5 = vpop.f32.mrf.mxu0 }
  0xe6   :  { %v1339_v6 = vpop.f32.mrf.mxu1  ;;  %v1318_v19 = vadd.f32 %v1317_v5, %v1316_v3 }
  0xe7   :  { %v1319_v7 = vpop.f32.mrf.mxu0  ;;  %v1340_v22 = vadd.f32 %v1339_v6, %v1338_v4 }
  0xe8   :  { %v1341_v8 = vpop.f32.mrf.mxu1  ;;  %v879_v21 = vadd.f32 %v1318_v19, %v1189_v20 }
  0xe9   :  { %v1320_v9 = vpop.f32.mrf.mxu0 }
  0xea   :  { %v1342_v10 = vpop.f32.mrf.mxu1  ;;  %v919_v24 = vadd.f32 %v1340_v22, %v879_v21 }
 0x103   :  { %v1360_v11 = vpop.f32.mrf.mxu0 }
 0x104   :  { %v1382_v12 = vpop.f32.mrf.mxu1 }
 0x105   :  { %v1361_v13 = vpop.f32.mrf.mxu0 }
 0x106   :  { %v1383_v14 = vpop.f32.mrf.mxu1  ;;  %v1362_v23 = vadd.f32 %v1361_v13, %v1360_v11 }
 0x107   :  { %v1363_v15 = vpop.f32.mrf.mxu0  ;;  %v1384_v26 = vadd.f32 %v1383_v14, %v1382_v12 }
 0x108   :  { %v1385_v16 = vpop.f32.mrf.mxu1  ;;  %v959_v25 = vadd.f32 %v1362_v23, %v919_v24 }
 0x109   :  { %v1364_v17 = vpop.f32.mrf.mxu0 }
 0x10a   :  { %v1386_v18 = vpop.f32.mrf.mxu1  ;;  %v999_v30 = vadd.f32 %v1384_v26, %v959_v25 }
 0x123   :  { %v1404_v27 = vpop.f32.mrf.mxu0 }
 0x124   :  { %v1426_v28 = vpop.f32.mrf.mxu1 }
 0x125   :  { %v1405_v29 = vpop.f32.mrf.mxu0 }
 0x126   :  { %v1406_v31 = vadd.f32 %v1405_v29, %v1404_v27  ;;  %v1427_v32 = vpop.f32.mrf.mxu1 }
 0x127   :  { %v1407_v33 = vpop.f32.mrf.mxu0  ;;  %v1428_v35 = vadd.f32 %v1427_v32, %v1426_v28 }
 0x128   :  { %v1039_v34 = vadd.f32 %v1406_v31, %v999_v30  ;;  %v1429_v36 = vpop.f32.mrf.mxu1 }
 0x129   :  { %v1408_v37 = vpop.f32.mrf.mxu0 }
 0x12a   :  { %v1079_v38 = vadd.f32 %v1428_v35, %v1039_v34  ;;  %v1430_v39 = vpop.f32.mrf.mxu1 }
 0x12c   :  { %v1084_v40 = vmax.f32 %v1079_v38, 0.0 }
 0x12e   :  { %1482 = vmatmul.mubr.f32.vlgmr.msra.gmra.mxu0 %v1084_v40 }
 0x1ee   :  { %v1174_v42 = vpop.f32.mrf.mxu0 }
 0x1ef   :  { %v1175_v43 = vadd.f32 %v1298_v41, %v1174_v42 }
 0x1f0   :  { %v1483_v44 = vpop.f32.mrf.mxu0 }
 0x1f1   :  { %v1299_v45 = vmul.f32 -1.442695, %v1175_v43 }
 0x1f3   :  { %1594 = vpow2.f32 %v1299_v45 }
 0x200   :  { %v1595_v46 = vpop.eup %1594 }
 0x201   :  { %v1181_v47 = vadd.f32 1.0, %v1595_v46 }
 0x203   :  { %1596 = vrcp.f32 %v1181_v47 }
 0x210   :  { %v1597_v48 = vpop.eup %1596 }
 0x211   :  { %1184 = vst [vmem:[%s1998_s5] sm:$0xff] %v1597_v48 }

</bundles_post_ra>
